<compile_context>
chip_gen: v7x
topology: tpu7x:2x2x1
jax: 0.10.0
libtpu: 0.0.40
codegen_flags: <defaults>
</compile_context>

<pallas_src>
import jax
import jax.numpy as jnp
from jax.experimental import pallas as pl
from jax.experimental.pallas import tpu as pltpu


def _row_chunks(rows, feat, dtype_bytes, *, max_chunks=8,
                min_chunk_bytes=2 * 1024 * 1024):
    """Static (start, size) row ranges covering [0, rows).

    Up to `max_chunks` chunks so multiple DMA queues can overlap, but never
    smaller than `min_chunk_bytes` per chunk (tiny inputs -> one DMA).  Chunk
    sizes are rounded to the dtype's sublane-packing multiple so only the
    final chunk can cross a packed-sublane tile boundary.
    """
    row_bytes = max(1, feat * dtype_bytes)
    total_bytes = rows * row_bytes
    k = max(1, min(max_chunks, rows, total_bytes // min_chunk_bytes))
    pack = max(8, 32 // max(1, dtype_bytes))   # 8 f32, 16 bf16/f16, 32 int8
    base = -(-rows // k)                       # ceil-div
    base = -(-base // pack) * pack             # round up to packing multiple
    chunks = []
    start = 0
    while start < rows:
        size = min(base, rows - start)
        chunks.append((start, size))
        start += size
    return chunks


def _make_hbm_copy_kernel(chunks):
    """Kernel: chunked HBM->HBM DMA of the whole (rows, feat) buffer."""

    def kernel(x_hbm, o_hbm, sem):
        copies = []
        for k, (start, size) in enumerate(chunks):
            cp = pltpu.make_async_copy(
                x_hbm.at[pl.ds(start, size), :],
                o_hbm.at[pl.ds(start, size), :],
                sem.at[k],
            )
            cp.start()                 # issue all DMAs first ...
            copies.append(cp)
        for cp in copies:              # ... then wait for all of them
            cp.wait()

    return kernel


def reshape_forward(xs):
    """Pallas equivalent of Reshape.forward: (N, ...) -> (N, prod(rest))."""
    n = xs.shape[0]
    feat = 1
    for d in xs.shape[1:]:
        feat *= d
    total = n * feat
    dtype_bytes = jnp.dtype(xs.dtype).itemsize

    if total == 0:
        # Nothing to copy.
        return jnp.reshape(xs, (n, feat))

    x2d = jnp.reshape(xs, (n, feat))   # metadata-only flatten in the wrapper
    chunks = _row_chunks(n, feat, dtype_bytes)

    return pl.pallas_call(
        _make_hbm_copy_kernel(chunks),
        out_shape=jax.ShapeDtypeStruct((n, feat), xs.dtype),
        in_specs=[pl.BlockSpec(memory_space=pl.ANY)],
        out_specs=pl.BlockSpec(memory_space=pl.ANY),
        scratch_shapes=[pltpu.SemaphoreType.DMA((len(chunks),))],
        cost_estimate=pl.CostEstimate(
            flops=0,
            transcendentals=0,
            bytes_accessed=2 * total * dtype_bytes,
        ),
    )(x2d)


if __name__ == "__main__":
    key = jax.random.PRNGKey(0)
    # Small NCHW input consistent with a VGG-style feature map.
    x = jax.random.normal(key, (2, 4, 16, 16), dtype=jnp.float32)

    y = reshape_forward(x)
    y = jax.block_until_ready(y)

    # Reference check against plain JAX reshape (same semantics as torch).
    y_ref = jnp.reshape(x, (x.shape[0], -1))
    assert y.shape == (2, 4 * 16 * 16), y.shape
    assert y.dtype == x.dtype
    assert bool(jnp.array_equal(y, y_ref))

    print("KERNEL_OK")
</pallas_src>

<mosaic_0001>
module attributes {stable_mosaic.version = 11 : i64} {
  func.func @kernel(%arg0: memref<2x1024xf32, #tpu.memory_space<any>>, %arg1: memref<2x1024xf32, #tpu.memory_space<any>>, %arg2: memref<1x!tpu.dma_semaphore, #tpu.memory_space<semaphore_mem>>) attributes {dimension_semantics = [], scalar_prefetch = 0 : i64, scratch_operands = 1 : i64, tpu.core_type = #tpu.core_type<tc>} {
    %c0_i32 = arith.constant 0 : i32
    %c0_i32_0 = arith.constant 0 : i32
    %c0_i32_1 = arith.constant 0 : i32
    %0 = tpu.memref_slice %arg0[%c0_i32_0, %c0_i32_1] : memref<2x1024xf32, #tpu.memory_space<any>> -> memref<2x1024xf32, #tpu.memory_space<any>>
    %c0_i32_2 = arith.constant 0 : i32
    %c0_i32_3 = arith.constant 0 : i32
    %1 = tpu.memref_slice %arg1[%c0_i32_2, %c0_i32_3] : memref<2x1024xf32, #tpu.memory_space<any>> -> memref<2x1024xf32, #tpu.memory_space<any>>
    %2 = tpu.memref_slice %arg2[%c0_i32] : memref<1x!tpu.dma_semaphore, #tpu.memory_space<semaphore_mem>> -> memref<1x!tpu.dma_semaphore, #tpu.memory_space<semaphore_mem>>
    %3 = tpu.memref_squeeze %2 : memref<1x!tpu.dma_semaphore, #tpu.memory_space<semaphore_mem>> -> memref<!tpu.dma_semaphore, #tpu.memory_space<semaphore_mem>>
    tpu.enqueue_dma source(%0 : memref<2x1024xf32, #tpu.memory_space<any>>) target(%1 : memref<2x1024xf32, #tpu.memory_space<any>>) target_semaphore(%3 : memref<!tpu.dma_semaphore, #tpu.memory_space<semaphore_mem>>)
    %c0_i32_4 = arith.constant 0 : i32
    %c0_i32_5 = arith.constant 0 : i32
    %c0_i32_6 = arith.constant 0 : i32
    %4 = tpu.memref_slice %arg0[%c0_i32_5, %c0_i32_6] : memref<2x1024xf32, #tpu.memory_space<any>> -> memref<2x1024xf32, #tpu.memory_space<any>>
    %c0_i32_7 = arith.constant 0 : i32
    %c0_i32_8 = arith.constant 0 : i32
    %5 = tpu.memref_slice %arg1[%c0_i32_7, %c0_i32_8] : memref<2x1024xf32, #tpu.memory_space<any>> -> memref<2x1024xf32, #tpu.memory_space<any>>
    %6 = tpu.memref_slice %arg2[%c0_i32_4] : memref<1x!tpu.dma_semaphore, #tpu.memory_space<semaphore_mem>> -> memref<1x!tpu.dma_semaphore, #tpu.memory_space<semaphore_mem>>
    %7 = tpu.memref_squeeze %6 : memref<1x!tpu.dma_semaphore, #tpu.memory_space<semaphore_mem>> -> memref<!tpu.dma_semaphore, #tpu.memory_space<semaphore_mem>>
    tpu.wait_dma2 semaphore(%7 : memref<!tpu.dma_semaphore, #tpu.memory_space<semaphore_mem>>) src(%4 : memref<2x1024xf32, #tpu.memory_space<any>>) dst(%5 : memref<2x1024xf32, #tpu.memory_space<any>>)
    return
  }
}

</mosaic_0001>

<bundles_post_ra>
// kernel: tpu_custom_call.1
= control target key start
LH: loop header
LB: loop body
LE: loop exit
PB: predicated region body
PF: predicated region fallthrough
CT: control target
= control target key end

     0   :  { %s35_s6 = smov [#allocation2]   ;;  %s36_s7 = smov [#allocation3]   ;;  %s54_s0 = inlined_call_operand.hbm [shape: f32[2,1024], index: 0, kind: input, shape index: {}]   ;;  %s55_s1 = inlined_call_operand.hbm [shape: f32[2,1024], index: 1, kind: output, shape index: {}]  }
   0x1   :  { %s37_s8 = smov 0  }
   0x2   :  { %18 = dma.general %s54_s0, 256, %s55_s1, %s35_s6, %s36_s7, [#allocation4], %s37_s8, 0  }
   0x3   :  { %33 = dma.done.wait [#allocation2], 256 }
   0x4   :  { %34 = vsyncadd [#allocation2], 4294967040 }
   0x5   :  { %23 = vsyncmov [#allocation2] }
   0x8   :  { %s24_s13 = vpop.sfrf %23 }
   0x9   :  { %p29_p0 = scmp.ne.s32.totalorder %s24_s13, 0 }
   0xb   :  { %28 = shalt.err (%p29_p0)  }

</bundles_post_ra>
